<compile_context>
chip_gen: v7x
topology: tpu7x:2x2x1
jax: 0.10.0
libtpu: 0.0.40
codegen_flags: <defaults>
</compile_context>

<pallas_src>
import jax
import jax.numpy as jnp
from jax.experimental import pallas as pl
from jax.experimental.pallas import tpu as pltpu

N_GRAPHEME = 168
N_VOWEL = 11
N_CONSONANT = 7
N_HEAD_TOTAL = N_GRAPHEME + N_VOWEL + N_CONSONANT           # 186
N_HEAD_PAD = ((N_HEAD_TOTAL + 127) // 128) * 128             # 256 (lane dense)


def _senet_head_kernel(
    x_ref,                       # [TB, C, HW] f32  backbone features, NCHW-native
    sw1_ref, sb1_ref,            # SE squeeze fc:  [C, C//r], [1, C//r]
    sw2_ref, sb2_ref,            # SE excite fc:   [C//r, C], [1, C]
    wf_ref, bf_ref,              # fused heads:    [C, 256],  [1, 256]
    o_ref,                       # output:         [TB, 256]
):
    x = x_ref[...]                                   # [TB, C, HW]
    hw = x.shape[-1]

    # Single streaming pass over x: the spatial mean over HW is simultaneously
    # the SE "squeeze" and the AdaptiveAvgPool2d(1).
    s = jnp.sum(x, axis=-1) * (1.0 / hw)             # [TB, C]

    # --- Squeeze-Excitation gate on the pooled vector ---
    z = jnp.dot(s, sw1_ref[...], preferred_element_type=jnp.float32) + sb1_ref[...]
    z = jnp.maximum(z, 0.0)                          # ReLU
    g = jax.nn.sigmoid(
        jnp.dot(z, sw2_ref[...], preferred_element_type=jnp.float32) + sb2_ref[...]
    )                                                # [TB, C]

    # Exact identity: mean(x * g[:,:,None], -1) == mean(x, -1) * g.
    pooled = s * g                                   # [TB, C]

    # --- Fused classifier heads (single lane-dense 256-wide matmul) ---
    o_ref[...] = (
        jnp.dot(pooled, wf_ref[...], preferred_element_type=jnp.float32)
        + bf_ref[...]
    ).astype(o_ref.dtype)


def _auto_batch_tile(B, C, HW, itemsize=4, x_budget_bytes=32 * 2**20):
    """Largest batch tile whose double-buffered x block fits the VMEM budget."""
    pad_c = ((C + 7) // 8) * 8            # second-minor dim -> sublane padding
    pad_hw = ((HW + 127) // 128) * 128    # minor dim        -> lane padding
    per_row = pad_c * pad_hw * itemsize
    tb = max(1, x_budget_bytes // (2 * per_row))   # 2 = BlockSpec double-buffer
    tb = int(min(tb, B))
    if tb >= 8:
        tb = (tb // 8) * 8                # keep MXU-friendly sublane multiples
    return max(tb, 1)


def custom_senet_head(x_nchw, params, *, tb=None):
    """x_nchw: [B, C, H, W] float32 backbone feature maps.

    tb: batch tile (None -> auto-sized so the double-buffered x block stays
        within ~32 MiB of VMEM, which fits v5e/v6e and v7x's 64 MiB).
    """
    B, C, H, W = x_nchw.shape
    HW = H * W

    # NCHW-native streaming layout: a free reshape, no extra HBM pass.
    x = x_nchw.reshape(B, C, HW)                                # [B, C, HW]

    TB = _auto_batch_tile(B, C, HW) if tb is None else min(tb, B)
    n_tiles = pl.cdiv(B, TB)
    B_pad = n_tiles * TB
    if B_pad != B:
        # Padded rows are independent garbage and get sliced off below.
        x = jnp.pad(x, ((0, B_pad - B), (0, 0), (0, 0)))

    # Fuse the three head weights into one lane-dense [C, 256] matmul.
    w_fused = jnp.concatenate([params["w1"], params["w2"], params["w3"]], axis=1)
    b_fused = jnp.concatenate([params["b1"], params["b2"], params["b3"]], axis=1)
    w_fused = jnp.pad(w_fused, ((0, 0), (0, N_HEAD_PAD - N_HEAD_TOTAL)))
    b_fused = jnp.pad(b_fused, ((0, 0), (0, N_HEAD_PAD - N_HEAD_TOTAL)))

    CR = params["se_w1"].shape[1]

    # VMEM budget from the actual double-buffered footprint (+ headroom).
    pad_c = ((C + 7) // 8) * 8
    pad_hw = ((HW + 127) // 128) * 128
    x_block_bytes = TB * pad_c * pad_hw * 4
    w_bytes = 4 * (C * CR + CR + CR * C + C + C * N_HEAD_PAD + N_HEAD_PAD)
    out_block_bytes = TB * N_HEAD_PAD * 4
    usage = 2 * (x_block_bytes + w_bytes + out_block_bytes)
    vmem_limit = int(min(100 * 2**20, max(32 * 2**20, usage + 4 * 2**20)))

    const = lambda i: (0, 0)
    grid_spec = pltpu.PrefetchScalarGridSpec(
        num_scalar_prefetch=0,
        grid=(n_tiles,),
        in_specs=[
            pl.BlockSpec((TB, C, HW), lambda i: (i, 0, 0)),   # x, streamed per tile
            pl.BlockSpec((C, CR), const),
            pl.BlockSpec((1, CR), const),
            pl.BlockSpec((CR, C), const),
            pl.BlockSpec((1, C), const),
            pl.BlockSpec((C, N_HEAD_PAD), const),
            pl.BlockSpec((1, N_HEAD_PAD), const),
        ],
        out_specs=pl.BlockSpec((TB, N_HEAD_PAD), lambda i: (i, 0)),
    )

    logits = pl.pallas_call(
        _senet_head_kernel,
        out_shape=jax.ShapeDtypeStruct((B_pad, N_HEAD_PAD), jnp.float32),
        grid_spec=grid_spec,
        compiler_params=pltpu.CompilerParams(
            dimension_semantics=("parallel",),        # megacore split on v7x
            vmem_limit_bytes=vmem_limit,
        ),
    )(
        x,
        params["se_w1"], params["se_b1"],
        params["se_w2"], params["se_b2"],
        w_fused, b_fused,
    )

    logits = logits[:B]
    x1 = logits[:, :N_GRAPHEME]
    x2 = logits[:, N_GRAPHEME:N_GRAPHEME + N_VOWEL]
    x3 = logits[:, N_GRAPHEME + N_VOWEL:N_HEAD_TOTAL]
    return x1, x2, x3


def init_params(key, n_features, se_reduction=4):
    ks = jax.random.split(key, 10)
    cr = n_features // se_reduction

    def lin(k, fan_in, fan_out):
        scale = 1.0 / jnp.sqrt(jnp.float32(fan_in))
        return jax.random.uniform(k, (fan_in, fan_out), jnp.float32, -scale, scale)

    return {
        "se_w1": lin(ks[0], n_features, cr),
        "se_b1": jnp.zeros((1, cr), jnp.float32),
        "se_w2": lin(ks[1], cr, n_features),
        "se_b2": jnp.zeros((1, n_features), jnp.float32),
        "w1": lin(ks[2], n_features, N_GRAPHEME),
        "b1": lin(ks[3], 1, N_GRAPHEME),
        "w2": lin(ks[4], n_features, N_VOWEL),
        "b2": lin(ks[5], 1, N_VOWEL),
        "w3": lin(ks[6], n_features, N_CONSONANT),
        "b3": lin(ks[7], 1, N_CONSONANT),
    }


if __name__ == "__main__":
    key = jax.random.PRNGKey(0)
    k_x, k_p = jax.random.split(key)

    # Small synthetic shapes: backbone feature maps [B, C, H, W]
    # (real se_resnet50 gives C=2048, 7x7 spatial; we use C=32, 8x8 here).
    B, C, H, W = 2, 32, 8, 8
    x = jax.random.normal(k_x, (B, C, H, W), jnp.float32)
    params = init_params(k_p, n_features=C)

    x1, x2, x3 = custom_senet_head(x, params)
    jax.block_until_ready((x1, x2, x3))

    assert x1.shape == (B, N_GRAPHEME)
    assert x2.shape == (B, N_VOWEL)
    assert x3.shape == (B, N_CONSONANT)

    # Sanity check against plain-JAX reference (written with the original
    # excite-multiply + second pool to validate the pooled = mean(x)*g identity).
    x3d = x.reshape(B, C, H * W)
    s0 = jnp.mean(x3d, axis=-1)
    z = jnp.maximum(s0 @ params["se_w1"] + params["se_b1"], 0.0)
    g = jax.nn.sigmoid(z @ params["se_w2"] + params["se_b2"])
    pooled = jnp.mean(x3d * g[:, :, None], axis=-1)
    ref1 = pooled @ params["w1"] + params["b1"]
    ref2 = pooled @ params["w2"] + params["b2"]
    ref3 = pooled @ params["w3"] + params["b3"]
    assert jnp.allclose(x1, ref1, atol=1e-4)
    assert jnp.allclose(x2, ref2, atol=1e-4)
    assert jnp.allclose(x3, ref3, atol=1e-4)

    print("KERNEL_OK")
</pallas_src>

<mosaic_0001>
module attributes {stable_mosaic.version = 11 : i64} {
  func.func @_senet_head_kernel(%arg0: i32, %arg1: memref<2x32x64xf32, #tpu.memory_space<vmem>>, %arg2: memref<32x8xf32, #tpu.memory_space<vmem>>, %arg3: memref<1x8xf32, #tpu.memory_space<vmem>>, %arg4: memref<8x32xf32, #tpu.memory_space<vmem>>, %arg5: memref<1x32xf32, #tpu.memory_space<vmem>>, %arg6: memref<32x256xf32, #tpu.memory_space<vmem>>, %arg7: memref<1x256xf32, #tpu.memory_space<vmem>>, %arg8: memref<2x256xf32, #tpu.memory_space<vmem>>) attributes {dimension_semantics = [#tpu.dimension_semantics<parallel>], iteration_bounds = array<i64: 1>, scalar_prefetch = 0 : i64, scratch_operands = 0 : i64, tpu.core_type = #tpu.core_type<tc>, window_params = [{transform_indices = @transform_0, window_bounds = array<i64: 2, 32, 64>}, {pipeline_mode = #tpu.pipeline_mode<synchronous>, transform_indices = @transform_1, window_bounds = array<i64: 32, 8>}, {pipeline_mode = #tpu.pipeline_mode<synchronous>, transform_indices = @transform_2, window_bounds = array<i64: 1, 8>}, {pipeline_mode = #tpu.pipeline_mode<synchronous>, transform_indices = @transform_3, window_bounds = array<i64: 8, 32>}, {pipeline_mode = #tpu.pipeline_mode<synchronous>, transform_indices = @transform_4, window_bounds = array<i64: 1, 32>}, {pipeline_mode = #tpu.pipeline_mode<synchronous>, transform_indices = @transform_5, window_bounds = array<i64: 32, 256>}, {pipeline_mode = #tpu.pipeline_mode<synchronous>, transform_indices = @transform_6, window_bounds = array<i64: 1, 256>}, {transform_indices = @transform_7, window_bounds = array<i64: 2, 256>}]} {
    %c0 = arith.constant 0 : index
    %c0_0 = arith.constant 0 : index
    %c0_1 = arith.constant 0 : index
    %0 = vector.load %arg1[%c0, %c0_0, %c0_1] : memref<2x32x64xf32, #tpu.memory_space<vmem>>, vector<2x32x64xf32>
    %cst = arith.constant dense<0.000000e+00> : vector<2x32xf32>
    %1 = vector.multi_reduction <add>, %0, %cst [2] : vector<2x32x64xf32> to vector<2x32xf32>
    %cst_2 = arith.constant 1.562500e-02 : f32
    %2 = vector.broadcast %cst_2 : f32 to vector<2x32xf32>
    %3 = arith.mulf %1, %2 : vector<2x32xf32>
    %c0_3 = arith.constant 0 : index
    %c0_4 = arith.constant 0 : index
    %4 = vector.load %arg2[%c0_3, %c0_4] : memref<32x8xf32, #tpu.memory_space<vmem>>, vector<32x8xf32>
    %cst_5 = arith.constant dense<0.000000e+00> : vector<2x8xf32>
    %5 = tpu.matmul %3, %4, %cst_5 {dimension_numbers = #tpu.dot_dimension_numbers<[1], [0], [0], [1], [0, 0, 1, 1], [], []>} : vector<2x32xf32>, vector<32x8xf32>, vector<2x8xf32> -> vector<2x8xf32>
    %c0_6 = arith.constant 0 : index
    %c0_7 = arith.constant 0 : index
    %6 = vector.load %arg3[%c0_6, %c0_7] : memref<1x8xf32, #tpu.memory_space<vmem>>, vector<1x8xf32>
    %7 = vector.broadcast %6 : vector<1x8xf32> to vector<2x8xf32>
    %8 = arith.addf %5, %7 : vector<2x8xf32>
    %cst_8 = arith.constant 0.000000e+00 : f32
    %9 = vector.broadcast %cst_8 : f32 to vector<2x8xf32>
    %10 = arith.maximumf %8, %9 : vector<2x8xf32>
    %c0_9 = arith.constant 0 : index
    %c0_10 = arith.constant 0 : index
    %11 = vector.load %arg4[%c0_9, %c0_10] : memref<8x32xf32, #tpu.memory_space<vmem>>, vector<8x32xf32>
    %cst_11 = arith.constant dense<0.000000e+00> : vector<2x32xf32>
    %12 = tpu.matmul %10, %11, %cst_11 {dimension_numbers = #tpu.dot_dimension_numbers<[1], [0], [0], [1], [0, 0, 1, 1], [], []>} : vector<2x8xf32>, vector<8x32xf32>, vector<2x32xf32> -> vector<2x32xf32>
    %c0_12 = arith.constant 0 : index
    %c0_13 = arith.constant 0 : index
    %13 = vector.load %arg5[%c0_12, %c0_13] : memref<1x32xf32, #tpu.memory_space<vmem>>, vector<1x32xf32>
    %14 = vector.broadcast %13 : vector<1x32xf32> to vector<2x32xf32>
    %15 = arith.addf %12, %14 : vector<2x32xf32>
    %16 = arith.negf %15 : vector<2x32xf32>
    %17 = math.exp %16 : vector<2x32xf32>
    %cst_14 = arith.constant 1.000000e+00 : f32
    %18 = vector.broadcast %cst_14 : f32 to vector<2x32xf32>
    %19 = arith.addf %18, %17 : vector<2x32xf32>
    %20 = arith.divf %18, %19 : vector<2x32xf32>
    %21 = arith.mulf %3, %20 : vector<2x32xf32>
    %c0_15 = arith.constant 0 : index
    %c0_16 = arith.constant 0 : index
    %22 = vector.load %arg6[%c0_15, %c0_16] : memref<32x256xf32, #tpu.memory_space<vmem>>, vector<32x256xf32>
    %cst_17 = arith.constant dense<0.000000e+00> : vector<2x256xf32>
    %23 = tpu.matmul %21, %22, %cst_17 {dimension_numbers = #tpu.dot_dimension_numbers<[1], [0], [0], [1], [0, 0, 1, 1], [], []>} : vector<2x32xf32>, vector<32x256xf32>, vector<2x256xf32> -> vector<2x256xf32>
    %c0_18 = arith.constant 0 : index
    %c0_19 = arith.constant 0 : index
    %24 = vector.load %arg7[%c0_18, %c0_19] : memref<1x256xf32, #tpu.memory_space<vmem>>, vector<1x256xf32>
    %25 = vector.broadcast %24 : vector<1x256xf32> to vector<2x256xf32>
    %26 = arith.addf %23, %25 : vector<2x256xf32>
    %c0_20 = arith.constant 0 : index
    %c0_21 = arith.constant 0 : index
    %27 = vector.load %arg8[%c0_20, %c0_21] : memref<2x256xf32, #tpu.memory_space<vmem>>, vector<2x256xf32>
    tpu.vector_store %arg8[%c0_20, %c0_21], %26 {strides = array<i32>} : memref<2x256xf32, #tpu.memory_space<vmem>>, vector<2x256xf32>,
    return
  }
  func.func @transform_0(%arg0: i32) -> (i32, i32, i32) {
    %c0_i32 = arith.constant 0 : i32
    %c0_i32_0 = arith.constant 0 : i32
    %c0_i32_1 = arith.constant 0 : i32
    return %arg0, %c0_i32, %c0_i32_0 : i32, i32, i32
  }
  func.func @transform_1(%arg0: i32) -> (i32, i32) {
    %c0_i32 = arith.constant 0 : i32
    %c0_i32_0 = arith.constant 0 : i32
    %c0_i32_1 = arith.constant 0 : i32
    return %c0_i32, %c0_i32_0 : i32, i32
  }
  func.func @transform_2(%arg0: i32) -> (i32, i32) {
    %c0_i32 = arith.constant 0 : i32
    %c0_i32_0 = arith.constant 0 : i32
    %c0_i32_1 = arith.constant 0 : i32
    return %c0_i32, %c0_i32_0 : i32, i32
  }
  func.func @transform_3(%arg0: i32) -> (i32, i32) {
    %c0_i32 = arith.constant 0 : i32
    %c0_i32_0 = arith.constant 0 : i32
    %c0_i32_1 = arith.constant 0 : i32
    return %c0_i32, %c0_i32_0 : i32, i32
  }
  func.func @transform_4(%arg0: i32) -> (i32, i32) {
    %c0_i32 = arith.constant 0 : i32
    %c0_i32_0 = arith.constant 0 : i32
    %c0_i32_1 = arith.constant 0 : i32
    return %c0_i32, %c0_i32_0 : i32, i32
  }
  func.func @transform_5(%arg0: i32) -> (i32, i32) {
    %c0_i32 = arith.constant 0 : i32
    %c0_i32_0 = arith.constant 0 : i32
    %c0_i32_1 = arith.constant 0 : i32
    return %c0_i32, %c0_i32_0 : i32, i32
  }
  func.func @transform_6(%arg0: i32) -> (i32, i32) {
    %c0_i32 = arith.constant 0 : i32
    %c0_i32_0 = arith.constant 0 : i32
    %c0_i32_1 = arith.constant 0 : i32
    return %c0_i32, %c0_i32_0 : i32, i32
  }
  func.func @transform_7(%arg0: i32) -> (i32, i32) {
    %c0_i32 = arith.constant 0 : i32
    %c0_i32_0 = arith.constant 0 : i32
    return %arg0, %c0_i32 : i32, i32
  }
}

</mosaic_0001>

<bundles_post_ra>
// kernel: tpu_custom_call.1
= control target key start
LH: loop header
LB: loop body
LE: loop exit
PB: predicated region body
PF: predicated region fallthrough
CT: control target
= control target key end

     0   :  { %12 = vsyncpa [#allocation3], 0  ;;  %s912_s0 = inlined_call_operand.hbm [shape: f32[2,32,64], index: 0, kind: input, shape index: {}]   ;;  %s913_s1 = inlined_call_operand.vmem [shape: f32[32,8], index: 1, kind: input, shape index: {}]   ;;  %s914_s2 = inlined_call_operand.vmem [shape: f32[1,8], index: 2, kind: input, shape index: {}]   ;;  %s915_s3 = inlined_call_operand.vmem [shape: f32[8,32], index: 3, kind: input, shape index: {}]   ;;  %s916_s4 = inlined_call_operand.vmem [shape: f32[1,32], index: 4, kind: input, shape index: {}]   ;;  %s917_s5 = inlined_call_operand.hbm [shape: f32[32,256], index: 5, kind: input, shape index: {}]   ;;  %s918_s6 = inlined_call_operand.vmem [shape: f32[1,256], index: 6, kind: input, shape index: {}]   ;;  %s919_s7 = inlined_call_operand.hbm [shape: f32[2,256], index: 7, kind: output, shape index: {}]  }
   0x1   :  { %13 = vsyncpa [#allocation6], 0 }
   0x2   :  { %14 = vsyncpa [#allocation4], 0  ;;  %s705_s24 = smov [#allocation2]   ;;  %s633_s28 = scalar_lea.hbm %s912_s0, 1024 }
   0x3   :  { %s20_s25 = sshll.u32 %s705_s24, 4  ;;  %p634_p0 = scmp.ne.s32.totalorder %s912_s0, %s633_s28  ;;  %s21_s25 = int_to_ptr.vmem [resolvable:$true] %s20_s25 }
   0x4   :  { %p637_p1 = scmp.lt.u32.totalorder %s633_s28, %s912_s0 }
   0x6   :  { %p639_p2 = pnand %p637_p1, %p634_p0 }
   0x8   :  { %642 = shalt.err (!%p639_p2)
}
   0x9   :  { %s643_s10 = scalar_lea.vmem %s21_s25, 1024  ;;  %p648_p4 = scmp.lt.s32.totalorder %s21_s25, %s21_s25 }
   0xa   :  { %p644_p3 = scmp.ne.s32.totalorder %s21_s25, %s643_s10  ;;  %p649_p5 = scmp.lt.s32.totalorder %s643_s10, %s643_s10 }
   0xc   :  { %p650_p6 = por %p649_p5, %p648_p4 }
   0xe   :  { %p651_p7 = pnand %p650_p6, %p644_p3 }
  0x10   :  { %654 = shalt.err (!%p651_p7)
}
  0x11   :  { %s706_s11 = smov 128   ;;  %s707_s12 = smov 8  }
  0x12   :  { %26 = dma.hbm_to_vmem [thread:$0]  %s912_s0, 1024, %s21_s25, [#allocation3], %s706_s11, %s706_s11, %s707_s12  }
  0x13   :  { %s708_s15 = smov [#allocation5]   ;;  %s655_s19 = scalar_lea.hbm %s917_s5, 1024 }
  0x14   :  { %s40_s16 = sshll.u32 %s708_s15, 4  ;;  %p656_p8 = scmp.ne.s32.totalorder %s917_s5, %s655_s19  ;;  %s41_s16 = int_to_ptr.vmem [resolvable:$true] %s40_s16 }
  0x15   :  { %p659_p9 = scmp.lt.u32.totalorder %s655_s19, %s917_s5 }
  0x17   :  { %p661_p10 = pnand %p659_p9, %p656_p8 }
  0x19   :  { %664 = shalt.err (!%p661_p10)
}
  0x1a   :  { %s665_s24 = scalar_lea.vmem %s41_s16, 1024  ;;  %p670_p12 = scmp.lt.s32.totalorder %s41_s16, %s41_s16 }
  0x1b   :  { %p666_p11 = scmp.ne.s32.totalorder %s41_s16, %s665_s24  ;;  %p671_p13 = scmp.lt.s32.totalorder %s665_s24, %s665_s24 }
  0x1d   :  { %p672_p0 = por %p671_p13, %p670_p12 }
  0x1f   :  { %p673_p1 = pnand %p672_p0, %p666_p11 }
  0x21   :  { %676 = shalt.err (!%p673_p1)
}
  0x22   :  { %s709_s0 = smov 256   ;;  %s710_s25 = smov 16  }
  0x23   :  { %46 = dma.hbm_to_vmem [thread:$0]  %s917_s5, 1024, %s41_s16, [#allocation6], %s709_s0, %s709_s0, %s710_s25  }
  0x24   :  { %699 = dma.done.wait [#allocation3], 1024  }
  0x25   :  { %700 = vsyncadd [#allocation3], 4294966272 }
  0x26   :  { %701 = dma.done.wait [#allocation6], 1024  }
  0x27   :  { %702 = vsyncadd [#allocation6], 4294966272  ;;  %vm63_vm0 = vcmask 523264   ;;  %v59_v0 = vld [vmem:[#allocation2 + $0x20] sm:$0xff]  ;;  %v60_v2 = vld [vmem:[#allocation2 + $0x28] sm:$0xff]  ;;  %v711_v19 = vmov 0.0|0.0   ;;  %v115_v24 = vlaneseq }
  0x28   :  { %v55_v1 = vld [vmem:[#allocation2] sm:$0xff]  ;;  %v76_v3 = vsel %vm63_vm0, %v59_v0, 0.0  ;;  %v56_v5 = vld [vmem:[#allocation2 + $0x8] sm:$0xff]  ;;  %v79_v6 = vsel %vm63_vm0, %v60_v2, 0.0  ;;  %v61_v8 = vld [vmem:[#allocation2 + $0x30] sm:$0xff]  ;;  %602 = vmatprep.subr.bf16.mxu0 %v711_v19  ;;  %vm712_vm1 = vmmov 0  }
  0x29   :  { %v64_v4 = vsel %vm63_vm0, %v55_v1, 0.0  ;;  %77 = vadd.xlane.f32.xlu1 %v76_v3  ;;  %v67_v7 = vsel %vm63_vm0, %v56_v5, 0.0  ;;  %v57_v9 = vld [vmem:[#allocation2 + $0x10] sm:$0xff]  ;;  %v82_v10 = vsel %vm63_vm0, %v61_v8, 0.0  ;;  %v62_v12 = vld [vmem:[#allocation2 + $0x38] sm:$0xff]  ;;  %v96_v16 = vld [vmem:[%s913_s1] sm:$0xff] }
  0x2a   :  { %65 = vadd.xlane.f32.xlu0 %v64_v4  ;;  %v70_v11 = vsel %vm63_vm0, %v57_v9, 0.0  ;;  %v58_v13 = vld [vmem:[#allocation2 + $0x18] sm:$0xff]  ;;  %v85_v14 = vsel %vm63_vm0, %v62_v12, 0.0  ;;  %v97_v17 = vld [vmem:[%s913_s1 + $0x8] sm:$0xff]  ;;  %v98_v20 = vld [vmem:[%s913_s1 + $0x10] sm:$0xff]  ;;  %v713_v23 = vmov 0.0  }
  0x2b   :  { %v73_v15 = vsel %vm63_vm0, %v58_v13, 0.0  ;;  %v603_v18 = vpack.c.bf16 %v97_v17, %v96_v16  ;;  %v99_v21 = vld [vmem:[%s913_s1 + $0x18] sm:$0xff]  ;;  %594 = vmatprep.mubr.msk.f32.mxu0 %vm712_vm1, %v713_v23  ;;  %597 = vmatprep.subr.mxu1 %v713_v23  ;;  %v116_v27 = vand.u32 127, %v115_v24  ;;  %v800_v29 = vshrl.u32 %v115_v24, 7  ;;  %v237_v1 = vld [vmem:[%s915_s3] sm:$0xff] }
  0x2c   :  { %v606_v22 = vpack.c.bf16 %v99_v21, %v98_v20  ;;  %599 = vmatprep.mubr.msk.f32.mxu1 %vm712_vm1, %v713_v23  ;;  %vm126_vm2 = vcmask 130112   ;;  %vm133_vm3 = vcmask 195712   ;;  %vm140_vm4 = vcmask 261312   ;;  %598 = vmatpush3.msra.mxu1 %v237_v1  ;;  %v572_v2 = vld [vmem:[%s914_s2] ss:$0 sm:$0xff] }
  0x2d   :  { %80 = vadd.xlane.f32.xlu1 %v79_v6  ;;  %604 = vmatpush3.bf16.msra.mxu0 %v603_v18  ;;  %v121_v28 = vadd.s32 4294967288, %v116_v27  ;;  %v128_v32 = vadd.s32 4294967280, %v116_v27  ;;  %v135_v36 = vadd.s32 4294967272, %v116_v27  ;;  %v810_v37 = vsub.s32 %v116_v27, %v800_v29 }
  0x2e   :  { %68 = vadd.xlane.f32.xlu0 %v67_v7  ;;  %605 = vmatprep.subr.bf16.mxu0 %v711_v19  ;;  %vm161_vm5 = vcmask 1041409   ;;  %vm163_vm6 = vcmask 261120   ;;  %vm245_vm7 = vcmask 64512   ;;  %v574_v7 = vld [vmem:[%s916_s4] ss:$0 sm:$0xff]  ;;  %v347_v18 = vsub.s32 1, %v800_v29 }
  0x2f   :  { %v803_v33 = vsub.s32 %v121_v28, %v800_v29  ;;  %v813_v38 = vsub.s32 %v128_v32, %v800_v29  ;;  %v828_v47 = vsub.s32 %v135_v36, %v800_v29  ;;  %v381_v36 = vld [vmem:[#allocation5 + $0x8] sm:$0xff]  ;;  %s715_s4 = smov [#allocation7]  }
  0x30   :  { %s562_s17 = sshll.u32 %s715_s4, 4  ;;  %s563_s17 = int_to_ptr.vmem [resolvable:$true] %s562_s17 }
  0x31   :  { %83 = vadd.xlane.f32.xlu1 %v82_v10  ;;  %607 = vmatpush3.bf16.msra.mxu0 %v606_v22  ;;  %s677_s18 = scalar_lea.vmem %s563_s17, 64  ;;  %p682_p3 = scmp.lt.s32.totalorder %s563_s17, %s563_s17 }
  0x32   :  { %71 = vadd.xlane.f32.xlu0 %v70_v11  ;;  %p678_p2 = scmp.ne.s32.totalorder %s563_s17, %s677_s18  ;;  %p683_p4 = scmp.lt.s32.totalorder %s677_s18, %s677_s18 }
  0x34   :  { %p684_p5 = por %p683_p4, %p682_p3 }
  0x35   :  { %86 = vadd.xlane.f32.xlu1 %v85_v14  ;;  %v714_v14 = vmov 0  }
  0x36   :  { %74 = vadd.xlane.f32.xlu0 %v73_v15  ;;  %628 = vset.pattern.permute.xlu1 %v714_v14  ;;  %v328_v15 = vsub.s32 0, %v800_v29  ;;  %p685_p6 = pnand %p684_p5, %p678_p2 }
  0x37   :  { %627 = vset.pattern.permute.xlu0 %v714_v14 }
  0xb6   :  { %v78_v25 = vpop.xlane.xlu1 %77 }
  0xb7   :  { %v66_v26 = vpop.xlane.xlu0 %65  ;;  %v815_v41 = vmul.f32 0.015625, %v78_v25 }
  0xb8   :  { %v817_v42 = vmul.f32 0.015625, %v66_v26 }
  0xb9   :  { %v145_v52 = vrot.slane %v815_v41, %v810_v37 }
  0xba   :  { %v81_v30 = vpop.xlane.xlu1 %80  ;;  %v120_v53 = vrot.slane %v817_v42, %v810_v37 }
  0xbb   :  { %v69_v31 = vpop.xlane.xlu0 %68  ;;  %v805_v34 = vmul.f32 0.015625, %v81_v30 }
  0xbc   :  { %v807_v35 = vmul.f32 0.015625, %v69_v31 }
  0xbd   :  { %v149_v45 = vrot.slane %v805_v34, %v803_v33 }
  0xbe   :  { %v84_v39 = vpop.xlane.xlu1 %83  ;;  %v125_v46 = vrot.slane %v807_v35, %v803_v33 }
  0xbf   :  { %v72_v40 = vpop.xlane.xlu0 %71  ;;  %v819_v43 = vmul.f32 0.015625, %v84_v39  ;;  %v150_v56 = vsel %vm126_vm2, %v149_v45, %v145_v52  ;;  %v380_v45 = vld [vmem:[#allocation5] sm:$0xff]  ;;  %v386_v52 = vld [vmem:[#allocation5 + $0x30] sm:$0xff] }
  0xc0   :  { %v821_v44 = vmul.f32 0.015625, %v72_v40  ;;  %v127_v57 = vsel %vm126_vm2, %v125_v46, %v120_v53  ;;  %v382_v46 = vld [vmem:[#allocation5 + $0x10] sm:$0xff] }
  0xc1   :  { %v154_v48 = vrot.slane %v819_v43, %v813_v38 }
  0xc2   :  { %v132_v49 = vrot.slane %v821_v44, %v813_v38  ;;  %v87_v50 = vpop.xlane.xlu1 %86 }
  0xc3   :  { %v75_v51 = vpop.xlane.xlu0 %74  ;;  %v838_v54 = vmul.f32 0.015625, %v87_v50  ;;  %v155_v60 = vsel %vm133_vm3, %v154_v48, %v150_v56 }
  0xc4   :  { %v840_v55 = vmul.f32 0.015625, %v75_v51  ;;  %v134_v61 = vsel %vm133_vm3, %v132_v49, %v127_v57  ;;  %v384_v51 = vld [vmem:[#allocation5 + $0x20] sm:$0xff] }
  0xc5   :  { %v159_v58 = vrot.slane %v838_v54, %v828_v47  ;;  %v614_v53 = vpack.c.bf16 %v386_v52, %v384_v51 }
  0xc6   :  { %v139_v59 = vrot.slane %v840_v55, %v828_v47 }
  0xc7   :  { %v160_v63 = vsel %vm140_vm4, %v159_v58, %v155_v60 }
  0xc8   :  { %v141_v62 = vsel %vm140_vm4, %v139_v59, %v134_v61 }
  0xc9   :  { %v162_v0 = vsel %vm161_vm5, %v160_v63, %v141_v62 }
  0xca   :  { %595 = vmatmul.mubr.msk.f32.vlgmr.msra.gmra.mrb[0].mxu0 %vm163_vm6, %v162_v0 }
 0x19d   :  { %v232_v3 = vpop.f32.mrb[0].mxu0 }
 0x19e   :  { %v233_v4 = vadd.f32 %v572_v2, %v232_v3  ;;  %v596_v5 = vpop.f32.mrb[1].mxu0 }
 0x1a0   :  { %v236_v6 = vmax.f32 %v233_v4, 0.0 }
 0x1a2   :  { %600 = vmatmul.mubr.msk.f32.vlgmr.msra.gmra.mrb[0].mxu1 %vm245_vm7, %v236_v6 }
 0x1a3   :  { %537 = vmatprep.mubr.f32.mxu1 %v713_v23 }
 0x275   :  { %v315_v8 = vpop.f32.mrb[0].mxu1 }
 0x276   :  { %v316_v9 = vadd.f32 %v574_v7, %v315_v8  ;;  %v601_v10 = vpop.f32.mrb[1].mxu1 }
 0x278   :  { %v576_v11 = vmul.f32 -1.442695, %v316_v9 }
 0x27a   :  { %629 = vpow2.f32 %v576_v11 }
 0x284   :  { %v630_v12 = vpop.eup %629 }
 0x285   :  { %v322_v13 = vadd.f32 1.0, %v630_v12 }
 0x287   :  { %631 = vrcp.f32 %v322_v13 }
 0x291   :  { %v632_v16 = vpop.eup %631 }
 0x292   :  { %v329_v17 = vrot.slane %v632_v16, %v328_v15  ;;  %v348_v19 = vrot.slane %v632_v16, %v347_v18 }
 0x294   :  { %335 = vbcast.lane.b32.xlu1 %v329_v17, 264  ;;  %331 = vbcast.lane.b32.xlu0 %v329_v17, 256 }
 0x298   :  { %350 = vbcast.lane.b32.xlu1 %v348_v19, 256  ;;  %339 = vbcast.lane.b32.xlu0 %v329_v17, 272 }
 0x29c   :  { %354 = vbcast.lane.b32.xlu1 %v348_v19, 264  ;;  %343 = vbcast.lane.b32.xlu0 %v329_v17, 280 }
 0x2a0   :  { %358 = vbcast.lane.b32.xlu1 %v348_v19, 272 }
 0x2a4   :  { %362 = vbcast.lane.b32.xlu1 %v348_v19, 280 }
 0x306   :  { %v336_v20 = vpop.permute.xlu1 %335  ;;  %v332_v21 = vpop.permute.xlu0 %331 }
 0x307   :  { %v373_v22 = vmul.f32 %v336_v20, %v807_v35  ;;  %v372_v23 = vmul.f32 %v332_v21, %v817_v42  ;;  %v383_v35 = vld [vmem:[#allocation5 + $0x18] sm:$0xff] }
 0x308   :  { %v608_v42 = vpack.c.bf16 %v383_v35, %v381_v36 }
 0x309   :  { %412 = vperm.xlu1 %628, %v373_v22   ;;  %409 = vperm.xlu0 %627, %v372_v23  }
 0x30a   :  { %v351_v24 = vpop.permute.xlu1 %350  ;;  %v340_v25 = vpop.permute.xlu0 %339  ;;  %609 = vmatprep.subr.bf16.mxu1 %v608_v42 }
 0x30b   :  { %v376_v26 = vmul.f32 %v351_v24, %v815_v41  ;;  %v374_v28 = vmul.f32 %v340_v25, %v821_v44  ;;  %v610_v41 = vpack.c.bf16 %v382_v46, %v380_v45  ;;  %v385_v44 = vld [vmem:[#allocation5 + $0x28] sm:$0xff] }
 0x30d   :  { %421 = vperm.xlu1 %628, %v376_v26   ;;  %611 = vmatpush1.bf16.msra.mxu1 %v610_v41 }
 0x30e   :  { %v355_v27 = vpop.permute.xlu1 %354  ;;  %v344_v31 = vpop.permute.xlu0 %343 }
 0x30f   :  { %v377_v30 = vmul.f32 %v355_v27, %v805_v34  ;;  %v375_v39 = vmul.f32 %v344_v31, %v840_v55  ;;  %v387_v34 = vld [vmem:[#allocation5 + $0x38] sm:$0xff] }
 0x310   :  { %v612_v50 = vpack.c.bf16 %v387_v34, %v385_v44 }
 0x311   :  { %424 = vperm.xlu0 %627, %v377_v30   ;;  %415 = vperm.xlu1 %628, %v374_v28  }
 0x312   :  { %v359_v32 = vpop.permute.xlu1 %358  ;;  %613 = vmatprep.subr.bf16.mxu1 %v612_v50 }
 0x313   :  { %v378_v40 = vmul.f32 %v359_v32, %v819_v43  ;;  %615 = vmatpush1.bf16.msra.mxu1 %v614_v53 }
 0x315   :  { %427 = vperm.xlu0 %627, %v378_v40   ;;  %418 = vperm.xlu1 %628, %v375_v39  }
 0x316   :  { %v363_v48 = vpop.permute.xlu1 %362 }
 0x317   :  { %v379_v49 = vmul.f32 %v363_v48, %v838_v54 }
 0x319   :  { %430 = vperm.xlu0 %627, %v379_v49  }
 0x388   :  { %v413_v43 = vpop.permute.xlu1 %412  ;;  %v410_v55 = vpop.permute.xlu0 %409 }
 0x389   :  { %v439_v61 = vrot.slane %v413_v43, %v803_v33  ;;  %v435_v62 = vrot.slane %v410_v55, %v810_v37 }
 0x38b   :  { %v440_v4 = vsel %vm126_vm2, %v439_v61, %v435_v62 }
 0x38c   :  { %v422_v56 = vpop.permute.xlu1 %421 }
 0x38d   :  { %v454_v1 = vrot.slane %v422_v56, %v810_v37  ;;  %v388_v37 = vld [vmem:[%s918_s6] sm:$0x3] }
 0x38e   :  { %v393_v10 = vrot.slane %v388_v37, %v328_v15 }
 0x390   :  { %v416_v57 = vpop.permute.xlu1 %415  ;;  %v425_v58 = vpop.permute.xlu0 %424 }
 0x391   :  { %v458_v54 = vrot.slane %v425_v58, %v803_v33  ;;  %v444_v63 = vrot.slane %v416_v57, %v813_v38 }
 0x393   :  { %v459_v5 = vsel %vm126_vm2, %v458_v54, %v454_v1  ;;  %v445_v7 = vsel %vm133_vm3, %v444_v63, %v440_v4 }
 0x394   :  { %v419_v59 = vpop.permute.xlu1 %418  ;;  %v428_v60 = vpop.permute.xlu0 %427 }
 0x395   :  { %v463_v0 = vrot.slane %v428_v60, %v813_v38  ;;  %v449_v2 = vrot.slane %v419_v59, %v828_v47 }
 0x397   :  { %v464_v8 = vsel %vm133_vm3, %v463_v0, %v459_v5  ;;  %v450_v33 = vsel %vm140_vm4, %v449_v2, %v445_v7 }
 0x398   :  { %v431_v3 = vpop.permute.xlu0 %430 }
 0x399   :  { %v468_v6 = vrot.slane %v431_v3, %v828_v47  ;;  %v397_v47 = vrot.slane %v388_v37, %v347_v18 }
 0x39b   :  { %v469_v9 = vsel %vm140_vm4, %v468_v6, %v464_v8 }
 0x39c   :  { %v470_v38 = vsel %vm161_vm5, %v469_v9, %v450_v33 }
 0x39d   :  { %577 = vmatmul.mubr.msk.f32.vlgmr.msra.gmra.mrb[2].mxu1 %vm163_vm6, %v470_v38 }
 0x470   :  { %v539_v11 = vpop.f32.mrb[2].mxu1 }
 0x471   :  { %v540_v12 = vadd.f32 %v539_v11, %v393_v10  ;;  %v541_v13 = vpop.f32.mrb[3].mxu1 }
 0x472   :  { %v542_v14 = vadd.f32 %v541_v13, %v397_v47 }
 0x474   :  { %v546_v16 = vcombine.low %v540_v12, %v542_v14 }
 0x476   :  { %578 = vst.sshfl [vmem:[#allocation7] sm:$0x33 pattern:$0x76325410] %v546_v16 }
 0x477   :  { %688 = shalt.err (!%p685_p6)
}
 0x478   :  { %s689_s20 = scalar_lea.hbm %s919_s7, 64 }
 0x479   :  { %p690_p7 = scmp.ne.s32.totalorder %s919_s7, %s689_s20  ;;  %p693_p8 = scmp.lt.u32.totalorder %s689_s20, %s919_s7 }
 0x47b   :  { %p695_p9 = pnand %p693_p8, %p690_p7 }
 0x47d   :  { %698 = shalt.err (!%p695_p9)
}
 0x47e   :  { %565 = dma.vmem_to_hbm [thread:$0]  %s563_s17, 64, %s919_s7, [#allocation4]  }
 0x47f   :  { %703 = dma.done.wait [#allocation4], 64  }
 0x480   :  { %704 = vsyncadd [#allocation4], 4294967232 }
 0x481   :  { %569 = vsyncpa [#allocation3], 1 }
 0x482   :  { %570 = vsyncpa [#allocation6], 1 }
 0x483   :  { %571 = vsyncpa [#allocation4], 1 }

</bundles_post_ra>
